<compile_context>
chip_gen: v5e
topology: v5e:2x2
jax: 0.10.0
libtpu: 0.0.40
codegen_flags: <defaults>
</compile_context>

<pallas_src>
import functools
import math

import jax
import jax.numpy as jnp
from jax.experimental import pallas as pl
from jax.experimental.pallas import tpu as pltpu


def _round_up(x, m):
    return ((x + m - 1) // m) * m


# ----------------------------------------------------------------------------
# Kernel 1: hoisted input projection  xin = x @ W_in.T + (b_in + b_rec)
# One big matmul over all (seq_len * batch) rows -> near-full MXU utilization.
# ----------------------------------------------------------------------------
def _input_proj_kernel(x_ref, w_ref, b_ref, o_ref):
    o_ref[...] = (
        jnp.dot(x_ref[...], w_ref[...], preferred_element_type=jnp.float32)
        + b_ref[...]
    )


def _input_projection(x_flat, w_t, bias, *, tm):
    rows, i_pad = x_flat.shape
    h_pad = w_t.shape[1]
    return pl.pallas_call(
        _input_proj_kernel,
        out_shape=jax.ShapeDtypeStruct((rows, h_pad), jnp.float32),
        grid_spec=pltpu.PrefetchScalarGridSpec(
            num_scalar_prefetch=0,
            grid=(rows // tm,),
            in_specs=[
                pl.BlockSpec((tm, i_pad), lambda i: (i, 0)),       # x rows
                pl.BlockSpec((i_pad, h_pad), lambda i: (0, 0)),    # W_in.T (resident)
                pl.BlockSpec((1, h_pad), lambda i: (0, 0)),        # fused bias
            ],
            out_specs=pl.BlockSpec((tm, h_pad), lambda i: (i, 0)),
        ),
        compiler_params=pltpu.CompilerParams(
            dimension_semantics=("parallel",)),
    )(x_flat, w_t, bias)


# ----------------------------------------------------------------------------
# Kernel 2: the sequential recurrence.
# grid = (num_batch_chunks ["parallel"], seq_len ["arbitrary"])
# Per step: one (B, H) x (H, H) MXU matmul + 3 VPU ops + relu.
# ----------------------------------------------------------------------------
def _eirnn_rec_kernel(xin_ref, noise_ref, eff_ref, out_ref, state_out_ref,
                      state_scr, *, alpha, oneminusalpha, sigma_rec):
    t = pl.program_id(1)

    @pl.when(t == 0)
    def _():
        # init_hidden: zero state (and therefore zero output = relu(0)).
        state_scr[...] = jnp.zeros_like(state_scr)

    prev_state = state_scr[...]
    prev_out = jnp.maximum(prev_state, 0.0)          # output carry == relu(state)

    eff = eff_ref[...]                               # precomputed (|W_rec|*mask).T
    h2h = jnp.dot(prev_out.astype(eff.dtype), eff,
                  preferred_element_type=jnp.float32)

    total_input = xin_ref[...] + h2h                 # input2h + biases already folded in
    state = (prev_state * oneminusalpha
             + total_input * alpha
             + sigma_rec * noise_ref[...])

    state_scr[...] = state
    out_ref[...] = jnp.maximum(state, 0.0)           # rnn activity at step t

    @pl.when(t == pl.num_programs(1) - 1)
    def _():
        state_out_ref[...] = state                   # final state, written once


# ----------------------------------------------------------------------------
# Wrapper
# ----------------------------------------------------------------------------
def eirnn_forward(x, noise, w_in, b_in, w_rec, mask, b_rec, *,
                  alpha, sigma_rec, rec_weight_dtype=jnp.float32):
    """Pallas EIRNN forward. Returns (output, (state, output_last)).

    rec_weight_dtype=jnp.bfloat16 halves the resident recurrent-weight VMEM and
    uses the bf16-native MXU on v6e/v7x (accumulation stays f32).
    """
    seq_len, batch, input_size = x.shape
    hidden_size = w_rec.shape[0]
    f32 = jnp.float32

    # --- pad to vreg/MXU friendly shapes: lanes (last dim) % 128, sublanes % 8
    h_pad = _round_up(hidden_size, 128)
    i_pad = _round_up(input_size, 128)
    b8 = _round_up(batch, 8)
    batch_block = min(b8, 256)                 # per-core batch chunk (megacore split)
    b_pad = _round_up(b8, batch_block)
    n_bblk = b_pad // batch_block

    x_p = jnp.zeros((seq_len, b_pad, i_pad), f32).at[:, :batch, :input_size].set(x)
    noise_p = jnp.zeros((seq_len, b_pad, h_pad), f32).at[:, :batch, :hidden_size].set(noise)

    w_in_t = jnp.zeros((i_pad, h_pad), f32).at[:input_size, :hidden_size].set(w_in.T)
    bias = jnp.zeros((1, h_pad), f32).at[0, :hidden_size].set(b_in + b_rec)

    # Loop-invariant effective recurrent weight, precomputed once (transposed).
    eff_t = (jnp.abs(w_rec) * mask).T
    eff_t = jnp.zeros((h_pad, h_pad), f32).at[:hidden_size, :hidden_size].set(eff_t)
    eff_t = eff_t.astype(rec_weight_dtype)

    # --- hoisted input projection over all timesteps at once
    rows = seq_len * b_pad
    tm = min(rows, 256)                        # rows is a multiple of 8
    rows_pad = _round_up(rows, tm)
    x_flat = x_p.reshape(rows, i_pad)
    if rows_pad != rows:
        x_flat = jnp.zeros((rows_pad, i_pad), f32).at[:rows].set(x_flat)
    xin = _input_projection(x_flat, w_in_t, bias, tm=tm)[:rows]
    xin = xin.reshape(seq_len, b_pad, h_pad)

    kernel = functools.partial(
        _eirnn_rec_kernel,
        alpha=float(alpha),
        oneminusalpha=float(1.0 - alpha),
        sigma_rec=float(sigma_rec),
    )

    grid_spec = pltpu.PrefetchScalarGridSpec(
        num_scalar_prefetch=0,
        grid=(n_bblk, seq_len),
        in_specs=[
            pl.BlockSpec((pl.Squeezed(), batch_block, h_pad),
                         lambda b, t: (t, b, 0)),                    # pre-projected input
            pl.BlockSpec((pl.Squeezed(), batch_block, h_pad),
                         lambda b, t: (t, b, 0)),                    # noise
            pl.BlockSpec((h_pad, h_pad), lambda b, t: (0, 0)),       # eff.T (resident)
        ],
        out_specs=[
            pl.BlockSpec((pl.Squeezed(), batch_block, h_pad),
                         lambda b, t: (t, b, 0)),                    # activity
            pl.BlockSpec((batch_block, h_pad), lambda b, t: (b, 0)), # final state
        ],
        scratch_shapes=[
            pltpu.VMEM((batch_block, h_pad), jnp.float32),           # single state carry
        ],
    )

    out_p, state_p = pl.pallas_call(
        kernel,
        out_shape=(
            jax.ShapeDtypeStruct((seq_len, b_pad, h_pad), jnp.float32),
            jax.ShapeDtypeStruct((b_pad, h_pad), jnp.float32),
        ),
        grid_spec=grid_spec,
        compiler_params=pltpu.CompilerParams(
            # batch chunks are independent (megacore-parallel on v7x);
            # time is the serial recurrence.
            dimension_semantics=("parallel", "arbitrary"),
        ),
    )(xin, noise_p, eff_t)

    output = out_p[:, :batch, :hidden_size]
    state = state_p[:batch, :hidden_size]
    return output, (state, output[-1])


# ----------------------------------------------------------------------------
# Pure-JAX reference (for verification)
# ----------------------------------------------------------------------------
def eirnn_reference(x, noise, w_in, b_in, w_rec, mask, b_rec, *, alpha, sigma_rec):
    eff = jnp.abs(w_rec) * mask

    def step(carry, inp):
        state, out = carry
        x_t, n_t = inp
        total = x_t @ w_in.T + b_in + out @ eff.T + b_rec
        state = state * (1.0 - alpha) + total * alpha + sigma_rec * n_t
        out = jnp.maximum(state, 0.0)
        return (state, out), out

    batch = x.shape[1]
    hidden = w_rec.shape[0]
    init = (jnp.zeros((batch, hidden), jnp.float32),
            jnp.zeros((batch, hidden), jnp.float32))
    (state, out_last), outs = jax.lax.scan(step, init, (x, noise))
    return outs, (state, out_last)


# ----------------------------------------------------------------------------
# Deterministic parameter initialization (mirrors the PyTorch __init__)
# ----------------------------------------------------------------------------
def make_params(key, input_size, hidden_size, e_prop=0.8):
    e_size = int(e_prop * hidden_size)
    i_size = hidden_size - e_size
    k1, k2, k3, k4 = jax.random.split(key, 4)

    # input2h = nn.Linear(input_size, hidden_size)
    bound_in = 1.0 / math.sqrt(input_size)
    w_in = jax.random.uniform(k1, (hidden_size, input_size), jnp.float32,
                              -bound_in, bound_in)
    b_in = jax.random.uniform(k2, (hidden_size,), jnp.float32,
                              -bound_in, bound_in)

    # h2h = EIRecLinear(hidden_size, 0.8)
    bound_rec = 1.0 / math.sqrt(hidden_size)
    w_rec = jax.random.uniform(k3, (hidden_size, hidden_size), jnp.float32,
                               -bound_rec, bound_rec)
    scale = jnp.where(jnp.arange(hidden_size) < e_size,
                      i_size / e_size, 1.0).astype(jnp.float32)
    w_rec = w_rec * scale[None, :]
    b_rec = jax.random.uniform(k4, (hidden_size,), jnp.float32,
                               -bound_rec, bound_rec)

    # mask: +1 columns for E units, -1 for I units, 0 on the diagonal
    col_sign = jnp.where(jnp.arange(hidden_size) < e_size, 1.0, -1.0)
    mask = jnp.tile(col_sign[None, :], (hidden_size, 1))
    mask = mask * (1.0 - jnp.eye(hidden_size, dtype=jnp.float32))
    mask = mask.astype(jnp.float32)

    return w_in, b_in, w_rec, mask, b_rec


# ----------------------------------------------------------------------------
if __name__ == "__main__":
    # Shapes consistent with the module: hidden_size=50 (e_prop=0.8 -> e=40),
    # batch_size=16, PerceptualDecisionMaking obs dim ~3; short sequence.
    seq_len, batch, input_size, hidden_size = 8, 16, 3, 50
    dt, tau, sigma_rec_cfg = 20.0, 100.0, 0.15
    alpha = dt / tau
    sigma_rec = math.sqrt(2.0 * alpha) * sigma_rec_cfg

    key = jax.random.PRNGKey(0)
    kx, kn, kp = jax.random.split(key, 3)

    x = jax.random.normal(kx, (seq_len, batch, input_size), jnp.float32)
    # Noise is pre-drawn N(0,1) and passed in (matches torch.randn_like semantics
    # with an externally fixed random stream, making the run deterministic).
    # TODO(synk): could use pltpu.prng_seed/prng_random_bits in-kernel instead.
    noise = jax.random.normal(kn, (seq_len, batch, hidden_size), jnp.float32)

    w_in, b_in, w_rec, mask, b_rec = make_params(kp, input_size, hidden_size)

    out, (state, out_last) = eirnn_forward(
        x, noise, w_in, b_in, w_rec, mask, b_rec,
        alpha=alpha, sigma_rec=sigma_rec)
    jax.block_until_ready(out)
    jax.block_until_ready(state)

    # Verify against a pure-JAX reference.
    out_ref, (state_ref, out_last_ref) = eirnn_reference(
        x, noise, w_in, b_in, w_rec, mask, b_rec,
        alpha=alpha, sigma_rec=sigma_rec)

    assert jnp.allclose(out, out_ref, atol=1e-5, rtol=1e-5), "activity mismatch"
    assert jnp.allclose(state, state_ref, atol=1e-5, rtol=1e-5), "state mismatch"
    assert jnp.allclose(out_last, out_last_ref, atol=1e-5, rtol=1e-5), "output mismatch"

    print("KERNEL_OK")
</pallas_src>

<mosaic_0001>
module attributes {stable_mosaic.version = 11 : i64} {
  func.func @_input_proj_kernel(%arg0: i32, %arg1: memref<128x128xf32, #tpu.memory_space<vmem>>, %arg2: memref<128x128xf32, #tpu.memory_space<vmem>>, %arg3: memref<1x128xf32, #tpu.memory_space<vmem>>, %arg4: memref<128x128xf32, #tpu.memory_space<vmem>>) attributes {dimension_semantics = [#tpu.dimension_semantics<parallel>], iteration_bounds = array<i64: 1>, scalar_prefetch = 0 : i64, scratch_operands = 0 : i64, tpu.core_type = #tpu.core_type<tc>, window_params = [{transform_indices = @transform_0, window_bounds = array<i64: 128, 128>}, {pipeline_mode = #tpu.pipeline_mode<synchronous>, transform_indices = @transform_1, window_bounds = array<i64: 128, 128>}, {pipeline_mode = #tpu.pipeline_mode<synchronous>, transform_indices = @transform_2, window_bounds = array<i64: 1, 128>}, {transform_indices = @transform_3, window_bounds = array<i64: 128, 128>}]} {
    %c0 = arith.constant 0 : index
    %c0_0 = arith.constant 0 : index
    %0 = vector.load %arg1[%c0, %c0_0] : memref<128x128xf32, #tpu.memory_space<vmem>>, vector<128x128xf32>
    %c0_1 = arith.constant 0 : index
    %c0_2 = arith.constant 0 : index
    %1 = vector.load %arg2[%c0_1, %c0_2] : memref<128x128xf32, #tpu.memory_space<vmem>>, vector<128x128xf32>
    %cst = arith.constant dense<0.000000e+00> : vector<128x128xf32>
    %2 = tpu.matmul %0, %1, %cst {dimension_numbers = #tpu.dot_dimension_numbers<[1], [0], [0], [1], [0, 0, 1, 1], [], []>} : vector<128x128xf32>, vector<128x128xf32>, vector<128x128xf32> -> vector<128x128xf32>
    %c0_3 = arith.constant 0 : index
    %c0_4 = arith.constant 0 : index
    %3 = vector.load %arg3[%c0_3, %c0_4] : memref<1x128xf32, #tpu.memory_space<vmem>>, vector<1x128xf32>
    %4 = vector.broadcast %3 : vector<1x128xf32> to vector<128x128xf32>
    %5 = arith.addf %2, %4 : vector<128x128xf32>
    %c0_5 = arith.constant 0 : index
    %c0_6 = arith.constant 0 : index
    %6 = vector.load %arg4[%c0_5, %c0_6] : memref<128x128xf32, #tpu.memory_space<vmem>>, vector<128x128xf32>
    tpu.vector_store %arg4[%c0_5, %c0_6], %5 {strides = array<i32>} : memref<128x128xf32, #tpu.memory_space<vmem>>, vector<128x128xf32>,
    return
  }
  func.func @transform_0(%arg0: i32) -> (i32, i32) {
    %c0_i32 = arith.constant 0 : i32
    %c0_i32_0 = arith.constant 0 : i32
    return %arg0, %c0_i32 : i32, i32
  }
  func.func @transform_1(%arg0: i32) -> (i32, i32) {
    %c0_i32 = arith.constant 0 : i32
    %c0_i32_0 = arith.constant 0 : i32
    %c0_i32_1 = arith.constant 0 : i32
    return %c0_i32, %c0_i32_0 : i32, i32
  }
  func.func @transform_2(%arg0: i32) -> (i32, i32) {
    %c0_i32 = arith.constant 0 : i32
    %c0_i32_0 = arith.constant 0 : i32
    %c0_i32_1 = arith.constant 0 : i32
    return %c0_i32, %c0_i32_0 : i32, i32
  }
  func.func @transform_3(%arg0: i32) -> (i32, i32) {
    %c0_i32 = arith.constant 0 : i32
    %c0_i32_0 = arith.constant 0 : i32
    return %arg0, %c0_i32 : i32, i32
  }
}

</mosaic_0001>

<bundles_post_ra>
// kernel: tpu_custom_call.1
= control target key start
LH: loop header
LB: loop body
LE: loop exit
PB: predicated region body
PF: predicated region fallthrough
CT: control target
= control target key end

     0   :  { %8 = vsyncpa [#allocation3], 0  ;;  %s362_s0 = inlined_call_operand.hbm [shape: f32[128,128], index: 0, kind: input, shape index: {}]   ;;  %s363_s1 = inlined_call_operand.hbm [shape: f32[128,128], index: 1, kind: input, shape index: {}]   ;;  %s364_s2 = inlined_call_operand.vmem [shape: f32[1,128], index: 2, kind: input, shape index: {}]   ;;  %s365_s3 = inlined_call_operand.hbm [shape: f32[128,128], index: 3, kind: output, shape index: {}]  }
   0x1   :  { %9 = vsyncpa [#allocation6], 0 }
   0x2   :  { %10 = vsyncpa [#allocation4], 0  ;;  %s15_s14 = sshll.u32 %s362_s0, 4  ;;  %s316_s15 = smov [#allocation2]   ;;  %s16_s14 = int_to_ptr.hbm [resolvable:$true] %s15_s14 }
   0x3   :  { %s17_s16 = sshll.u32 %s316_s15, 4  ;;  %s28_s19 = sshll.u32 %s363_s1, 4  ;;  %s18_s16 = int_to_ptr.vmem [resolvable:$true] %s17_s16  ;;  %s29_s19 = int_to_ptr.hbm [resolvable:$true] %s28_s19 }
   0x4   :  { %s317_s20 = smov 128   ;;  %s318_s21 = smov 8  }
   0x5   :  { %23 = dma.hbm_to_vmem [thread:$0]  %s16_s14, 2048, %s18_s16, [#allocation3], %s317_s20, %s317_s20, %s318_s21  }
   0x6   :  { %s319_s22 = smov [#allocation5]  }
   0x7   :  { %s30_s23 = sshll.u32 %s319_s22, 4  ;;  %s31_s23 = int_to_ptr.vmem [resolvable:$true] %s30_s23 }
   0x8   :  { %36 = dma.hbm_to_vmem [thread:$0]  %s29_s19, 2048, %s31_s23, [#allocation6], %s317_s20, %s317_s20, %s318_s21  }
   0x9   :  { %310 = dma.done.wait [#allocation3], 2048  }
   0xa   :  { %311 = vsyncadd [#allocation3], 4294965248 }
   0xb   :  { %312 = dma.done.wait [#allocation6], 2048  }
   0xc   :  { %313 = vsyncadd [#allocation6], 4294965248  ;;  %v78_v0 = vld [vmem:[#allocation5 + $0x78] sm:$0xff]  ;;  %v77_v1 = vld [vmem:[#allocation5 + $0x70] sm:$0xff]  ;;  %s170_s27 = sshll.u32 %s365_s3, 4  ;;  %s171_s27 = int_to_ptr.hbm [resolvable:$true] %s170_s27 }
   0xd   :  { %185 = vmatpush.msra.mxu2 %v78_v0  ;;  %186 = vmatpush.msra.mxu3 %v78_v0  ;;  %v76_v2 = vld [vmem:[#allocation5 + $0x68] sm:$0xff]  ;;  %v75_v3 = vld [vmem:[#allocation5 + $0x60] sm:$0xff]  ;;  %v74_v4 = vld [vmem:[#allocation5 + $0x58] sm:$0xff] }
   0xe   :  { %83 = vmatpush.msra.mxu0 %v78_v0  ;;  %184 = vmatpush.msra.mxu1 %v78_v0  ;;  %v73_v5 = vld [vmem:[#allocation5 + $0x50] sm:$0xff]  ;;  %v72_v6 = vld [vmem:[#allocation5 + $0x48] sm:$0xff]  ;;  %v71_v7 = vld [vmem:[#allocation5 + $0x40] sm:$0xff] }
   0xf   :  { %188 = vmatpush.msra.mxu2 %v77_v1  ;;  %189 = vmatpush.msra.mxu3 %v77_v1  ;;  %v70_v8 = vld [vmem:[#allocation5 + $0x38] sm:$0xff]  ;;  %v69_v9 = vld [vmem:[#allocation5 + $0x30] sm:$0xff]  ;;  %v68_v10 = vld [vmem:[#allocation5 + $0x28] sm:$0xff] }
  0x10   :  { %84 = vmatpush.msra.mxu0 %v77_v1  ;;  %187 = vmatpush.msra.mxu1 %v77_v1  ;;  %v67_v11 = vld [vmem:[#allocation5 + $0x20] sm:$0xff]  ;;  %v66_v12 = vld [vmem:[#allocation5 + $0x18] sm:$0xff]  ;;  %v65_v13 = vld [vmem:[#allocation5 + $0x10] sm:$0xff] }
  0x11   :  { %191 = vmatpush.msra.mxu2 %v76_v2  ;;  %192 = vmatpush.msra.mxu3 %v76_v2  ;;  %v64_v14 = vld [vmem:[#allocation5 + $0x8] sm:$0xff]  ;;  %v63_v15 = vld [vmem:[#allocation5] sm:$0xff]  ;;  %v57_v24 = vld [vmem:[#allocation2 + $0x50] sm:$0xff] }
  0x12   :  { %85 = vmatpush.msra.mxu0 %v76_v2  ;;  %190 = vmatpush.msra.mxu1 %v76_v2  ;;  %v55_v16 = vld [vmem:[#allocation2 + $0x40] sm:$0xff]  ;;  %v56_v20 = vld [vmem:[#allocation2 + $0x48] sm:$0xff]  ;;  %v61_v25 = vld [vmem:[#allocation2 + $0x70] sm:$0xff] }
  0x13   :  { %194 = vmatpush.msra.mxu2 %v75_v3  ;;  %195 = vmatpush.msra.mxu3 %v75_v3  ;;  %v59_v17 = vld [vmem:[#allocation2 + $0x60] sm:$0xff]  ;;  %v60_v21 = vld [vmem:[#allocation2 + $0x68] sm:$0xff]  ;;  %v49_v26 = vld [vmem:[#allocation2 + $0x10] sm:$0xff] }
  0x14   :  { %86 = vmatpush.msra.mxu0 %v75_v3  ;;  %193 = vmatpush.msra.mxu1 %v75_v3  ;;  %v47_v18 = vld [vmem:[#allocation2] sm:$0xff]  ;;  %v48_v22 = vld [vmem:[#allocation2 + $0x8] sm:$0xff]  ;;  %v53_v27 = vld [vmem:[#allocation2 + $0x30] sm:$0xff] }
  0x15   :  { %197 = vmatpush.msra.mxu2 %v74_v4  ;;  %198 = vmatpush.msra.mxu3 %v74_v4  ;;  %v51_v19 = vld [vmem:[#allocation2 + $0x20] sm:$0xff]  ;;  %v52_v23 = vld [vmem:[#allocation2 + $0x28] sm:$0xff]  ;;  %v58_v28 = vld [vmem:[#allocation2 + $0x58] sm:$0xff] }
  0x16   :  { %87 = vmatpush.msra.mxu0 %v74_v4  ;;  %196 = vmatpush.msra.mxu1 %v74_v4  ;;  %v62_v29 = vld [vmem:[#allocation2 + $0x78] sm:$0xff]  ;;  %v237_v32 = vld [vmem:[%s364_s2] ss:$0 sm:$0xff]  ;;  %s320_s2 = smov [#allocation7]  }
  0x17   :  { %200 = vmatpush.msra.mxu2 %v73_v5  ;;  %201 = vmatpush.msra.mxu3 %v73_v5  ;;  %v50_v30 = vld [vmem:[#allocation2 + $0x18] sm:$0xff]  ;;  %s168_s24 = sshll.u32 %s320_s2, 4  ;;  %s169_s24 = int_to_ptr.vmem [resolvable:$true] %s168_s24 }
  0x18   :  { %88 = vmatpush.msra.mxu0 %v73_v5  ;;  %199 = vmatpush.msra.mxu1 %v73_v5  ;;  %v54_v31 = vld [vmem:[#allocation2 + $0x38] sm:$0xff] }
  0x19   :  { %203 = vmatpush.msra.mxu2 %v72_v6  ;;  %204 = vmatpush.msra.mxu3 %v72_v6 }
  0x1a   :  { %89 = vmatpush.msra.mxu0 %v72_v6  ;;  %202 = vmatpush.msra.mxu1 %v72_v6 }
  0x1b   :  { %206 = vmatpush.msra.mxu2 %v71_v7  ;;  %207 = vmatpush.msra.mxu3 %v71_v7 }
  0x1c   :  { %90 = vmatpush.msra.mxu0 %v71_v7  ;;  %205 = vmatpush.msra.mxu1 %v71_v7 }
  0x1d   :  { %209 = vmatpush.msra.mxu2 %v70_v8  ;;  %210 = vmatpush.msra.mxu3 %v70_v8 }
  0x1e   :  { %91 = vmatpush.msra.mxu0 %v70_v8  ;;  %208 = vmatpush.msra.mxu1 %v70_v8 }
  0x1f   :  { %212 = vmatpush.msra.mxu2 %v69_v9  ;;  %213 = vmatpush.msra.mxu3 %v69_v9 }
  0x20   :  { %92 = vmatpush.msra.mxu0 %v69_v9  ;;  %211 = vmatpush.msra.mxu1 %v69_v9 }
  0x21   :  { %215 = vmatpush.msra.mxu2 %v68_v10  ;;  %216 = vmatpush.msra.mxu3 %v68_v10 }
  0x22   :  { %93 = vmatpush.msra.mxu0 %v68_v10  ;;  %214 = vmatpush.msra.mxu1 %v68_v10 }
  0x23   :  { %218 = vmatpush.msra.mxu2 %v67_v11  ;;  %219 = vmatpush.msra.mxu3 %v67_v11 }
  0x24   :  { %94 = vmatpush.msra.mxu0 %v67_v11  ;;  %217 = vmatpush.msra.mxu1 %v67_v11 }
  0x25   :  { %221 = vmatpush.msra.mxu2 %v66_v12  ;;  %222 = vmatpush.msra.mxu3 %v66_v12 }
  0x26   :  { %95 = vmatpush.msra.mxu0 %v66_v12  ;;  %220 = vmatpush.msra.mxu1 %v66_v12 }
  0x27   :  { %224 = vmatpush.msra.mxu2 %v65_v13  ;;  %225 = vmatpush.msra.mxu3 %v65_v13 }
  0x28   :  { %96 = vmatpush.msra.mxu0 %v65_v13  ;;  %223 = vmatpush.msra.mxu1 %v65_v13 }
  0x29   :  { %227 = vmatpush.msra.mxu2 %v64_v14  ;;  %228 = vmatpush.msra.mxu3 %v64_v14 }
  0x2a   :  { %97 = vmatpush.msra.mxu0 %v64_v14  ;;  %226 = vmatpush.msra.mxu1 %v64_v14 }
  0x2b   :  { %230 = vmatpush.msra.mxu2 %v63_v15  ;;  %231 = vmatpush.msra.mxu3 %v63_v15 }
  0x2c   :  { %123 = vmatmul.f32.vlgmr.msra.gmra.mxu2 %v55_v16  ;;  %135 = vmatmul.f32.vlgmr.msra.gmra.mxu3 %v59_v17 }
  0x2d   :  { %98 = vmatpush.msra.mxu0 %v63_v15  ;;  %229 = vmatpush.msra.mxu1 %v63_v15 }
  0x2e   :  { %99 = vmatmul.f32.vlgmr.msra.gmra.mxu0 %v47_v18  ;;  %111 = vmatmul.f32.vlgmr.msra.gmra.mxu1 %v51_v19 }
  0x34   :  { %126 = vmatmul.f32.gmra.mxu2 %v56_v20  ;;  %138 = vmatmul.f32.gmra.mxu3 %v60_v21 }
  0x36   :  { %102 = vmatmul.f32.gmra.mxu0 %v48_v22  ;;  %114 = vmatmul.f32.gmra.mxu1 %v52_v23 }
  0x3c   :  { %129 = vmatmul.f32.gmra.mxu2 %v57_v24  ;;  %141 = vmatmul.f32.gmra.mxu3 %v61_v25 }
  0x3e   :  { %105 = vmatmul.f32.gmra.mxu0 %v49_v26  ;;  %117 = vmatmul.f32.gmra.mxu1 %v53_v27 }
  0x44   :  { %132 = vmatmul.f32.gmra.mxu2 %v58_v28  ;;  %144 = vmatmul.f32.gmra.mxu3 %v62_v29 }
  0x46   :  { %108 = vmatmul.f32.gmra.mxu0 %v50_v30  ;;  %120 = vmatmul.f32.gmra.mxu1 %v54_v31 }
  0xab   :  { %v100_v33 = vpop.f32.mrf.mxu0  ;;  %v112_v34 = vpop.f32.mrf.mxu1 }
  0xac   :  { %v101_v35 = vadd.f32 %v237_v32, %v100_v33  ;;  %v113_v36 = vadd.f32 %v237_v32, %v112_v34 }
  0xae   :  { %148 = vst [vmem:[#allocation7] sm:$0xff] %v101_v35 }
  0xaf   :  { %152 = vst [vmem:[#allocation7 + $0x20] sm:$0xff] %v113_v36  ;;  %v124_v37 = vpop.f32.mrf.mxu2  ;;  %v136_v38 = vpop.f32.mrf.mxu3 }
  0xb0   :  { %v125_v39 = vadd.f32 %v237_v32, %v124_v37  ;;  %v137_v40 = vadd.f32 %v237_v32, %v136_v38 }
  0xb2   :  { %156 = vst [vmem:[#allocation7 + $0x40] sm:$0xff] %v125_v39 }
  0xb3   :  { %160 = vst [vmem:[#allocation7 + $0x60] sm:$0xff] %v137_v40  ;;  %v103_v41 = vpop.f32.mrf.mxu0  ;;  %v115_v42 = vpop.f32.mrf.mxu1 }
  0xb4   :  { %v104_v43 = vadd.f32 %v237_v32, %v103_v41  ;;  %v116_v44 = vadd.f32 %v237_v32, %v115_v42 }
  0xb6   :  { %149 = vst [vmem:[#allocation7 + $0x8] sm:$0xff] %v104_v43 }
  0xb7   :  { %153 = vst [vmem:[#allocation7 + $0x28] sm:$0xff] %v116_v44  ;;  %v127_v45 = vpop.f32.mrf.mxu2  ;;  %v139_v46 = vpop.f32.mrf.mxu3 }
  0xb8   :  { %v128_v47 = vadd.f32 %v237_v32, %v127_v45  ;;  %v140_v48 = vadd.f32 %v237_v32, %v139_v46 }
  0xba   :  { %157 = vst [vmem:[#allocation7 + $0x48] sm:$0xff] %v128_v47 }
  0xbb   :  { %161 = vst [vmem:[#allocation7 + $0x68] sm:$0xff] %v140_v48  ;;  %v106_v49 = vpop.f32.mrf.mxu0  ;;  %v118_v50 = vpop.f32.mrf.mxu1 }
  0xbc   :  { %v107_v51 = vadd.f32 %v237_v32, %v106_v49  ;;  %v119_v52 = vadd.f32 %v237_v32, %v118_v50 }
  0xbe   :  { %150 = vst [vmem:[#allocation7 + $0x10] sm:$0xff] %v107_v51 }
  0xbf   :  { %154 = vst [vmem:[#allocation7 + $0x30] sm:$0xff] %v119_v52  ;;  %v130_v53 = vpop.f32.mrf.mxu2  ;;  %v142_v54 = vpop.f32.mrf.mxu3 }
  0xc0   :  { %v131_v55 = vadd.f32 %v237_v32, %v130_v53  ;;  %v143_v56 = vadd.f32 %v237_v32, %v142_v54 }
  0xc2   :  { %158 = vst [vmem:[#allocation7 + $0x50] sm:$0xff] %v131_v55 }
  0xc3   :  { %162 = vst [vmem:[#allocation7 + $0x70] sm:$0xff] %v143_v56  ;;  %v109_v57 = vpop.f32.mrf.mxu0  ;;  %v121_v58 = vpop.f32.mrf.mxu1 }
  0xc4   :  { %v110_v59 = vadd.f32 %v237_v32, %v109_v57  ;;  %v122_v60 = vadd.f32 %v237_v32, %v121_v58 }
  0xc6   :  { %151 = vst [vmem:[#allocation7 + $0x18] sm:$0xff] %v110_v59 }
  0xc7   :  { %155 = vst [vmem:[#allocation7 + $0x38] sm:$0xff] %v122_v60  ;;  %v133_v61 = vpop.f32.mrf.mxu2  ;;  %v145_v62 = vpop.f32.mrf.mxu3 }
  0xc8   :  { %v134_v63 = vadd.f32 %v237_v32, %v133_v61  ;;  %v146_v0 = vadd.f32 %v237_v32, %v145_v62 }
  0xca   :  { %159 = vst [vmem:[#allocation7 + $0x58] sm:$0xff] %v134_v63 }
  0xcb   :  { %163 = vst [vmem:[#allocation7 + $0x78] sm:$0xff] %v146_v0 }
  0xcc   :  { %176 = dma.vmem_to_hbm [thread:$0]  %s169_s24, 2048, %s171_s27, [#allocation4], %s317_s20, %s317_s20, %s318_s21  }
  0xcd   :  { %314 = dma.done.wait [#allocation4], 2048  }
  0xce   :  { %315 = vsyncadd [#allocation4], 4294965248 }
  0xcf   :  { %181 = vsyncpa [#allocation3], 1 }
  0xd0   :  { %182 = vsyncpa [#allocation6], 1 }
  0xd1   :  { %183 = vsyncpa [#allocation4], 1 }

</bundles_post_ra>
